<compile_context>
chip_gen: v5e
topology: v5e:2x2
jax: 0.10.0
libtpu: 0.0.40
codegen_flags: <defaults>
</compile_context>

<pallas_src>
import jax
import jax.numpy as jnp
from jax.experimental import pallas as pl
from jax.experimental.pallas import tpu as pltpu


# Per-channel elements per block along the flattened lane axis (multiple of 128).
# Padded VMEM footprint per array per block <= 8 sublanes * 65536 * 4B = 2 MiB.
_LANE_TILE_CAP = 65536


def _round_up(x, m):
    return ((x + m - 1) // m) * m


def _percent_kernel(params_ref, x_ref, rescale_ref, soft_ref):
    # params_ref (SMEM, f32[4]): [a*CTG, a*WATER, a*AIR, -a*AIR - 1]
    # x_ref block: (BT, 3, T)   rescale_ref: (BT, 1, T)   soft_ref: (BT, 3, T)
    w0 = params_ref[0]
    w1 = params_ref[1]
    w2 = params_ref[2]
    b = params_ref[3]

    xb = x_ref[...]           # (BT, 3, T)
    x0 = xb[:, 0, :]
    x1 = xb[:, 1, :]
    x2 = xb[:, 2, :]

    # Numerically-stable 3-way softmax over the channel axis (VPU + EUP only).
    m = jnp.maximum(jnp.maximum(x0, x1), x2)
    e0 = jnp.exp(x0 - m)
    e1 = jnp.exp(x1 - m)
    e2 = jnp.exp(x2 - m)
    inv = 1.0 / (e0 + e1 + e2)
    s0 = e0 * inv
    s1 = e1 * inv
    s2 = e2 * inv

    soft_ref[:, 0, :] = s0.astype(soft_ref.dtype)
    soft_ref[:, 1, :] = s1.astype(soft_ref.dtype)
    soft_ref[:, 2, :] = s2.astype(soft_ref.dtype)

    # Constant-folded:  2 * (ct - AIR) / (3000 - AIR) - 1
    rescale_ref[:, 0, :] = (w0 * s0 + w1 * s1 + w2 * s2 + b).astype(rescale_ref.dtype)


def percent_layer(x, ctg, water, air):
    """x: [N, 3, H, W] float32.  Returns (rescale [N,1,H,W], softmax [N,3,H,W])."""
    n, c, h, w = x.shape
    assert c == 3, "PercentLayer expects 3 input channels"
    L = h * w

    # Flatten spatial dims (free for contiguous NCHW) -> lane-dense last axis.
    x2d = x.reshape(n, 3, L)

    # Tiling: large lane tile; fold batch items when the image is small.
    if L >= _LANE_TILE_CAP:
        bt, t = 1, _LANE_TILE_CAP                 # t is a multiple of 128
    else:
        t = L                                     # full-extent last dim (always legal)
        bt = max(1, min(n, _LANE_TILE_CAP // _round_up(L, 128)))

    grid = (pl.cdiv(n, bt), pl.cdiv(L, t))

    # Precompute the folded epilogue constants on the host, ship via SMEM so
    # changing CTG/WATER/AIR does not trigger a recompile.
    a = 2.0 / (3000.0 - float(air))
    params = jnp.array(
        [a * float(ctg), a * float(water), a * float(air), -a * float(air) - 1.0],
        dtype=jnp.float32,
    )

    out_shapes = (
        jax.ShapeDtypeStruct((n, 1, L), x.dtype),
        jax.ShapeDtypeStruct((n, 3, L), x.dtype),
    )

    rescale2d, soft2d = pl.pallas_call(
        _percent_kernel,
        out_shape=out_shapes,
        grid_spec=pltpu.PrefetchScalarGridSpec(
            num_scalar_prefetch=0,
            grid=grid,
            in_specs=[
                pl.BlockSpec(memory_space=pltpu.MemorySpace.SMEM),          # params
                pl.BlockSpec((bt, 3, t), lambda i, j: (i, 0, j)),           # x
            ],
            out_specs=[
                pl.BlockSpec((bt, 1, t), lambda i, j: (i, 0, j)),           # rescale
                pl.BlockSpec((bt, 3, t), lambda i, j: (i, 0, j)),           # softmax
            ],
        ),
        compiler_params=pltpu.CompilerParams(
            dimension_semantics=("parallel", "parallel"),
        ),
    )(params, x2d)

    return rescale2d.reshape(n, 1, h, w), soft2d.reshape(n, 3, h, w)


def percent_layer_ref(x, ctg, water, air):
    """Pure-JAX reference mirroring the PyTorch forward."""
    sm = jax.nn.softmax(x, axis=1)
    ct = ctg * sm[:, 0] + water * sm[:, 1] + air * sm[:, 2]
    ct = ct[:, None]
    rescale = (ct - air) / (3000.0 - air)
    rescale = 2.0 * rescale - 1.0
    return rescale, sm


def _check(shape, ctg, water, air, key):
    x = jax.random.normal(key, shape, dtype=jnp.float32)
    rescale, soft = percent_layer(x, ctg, water, air)
    rescale = jax.block_until_ready(rescale)
    soft = jax.block_until_ready(soft)

    rescale_ref, soft_ref = percent_layer_ref(x, ctg, water, air)

    n, _, h, w = shape
    assert rescale.shape == (n, 1, h, w)
    assert soft.shape == (n, 3, h, w)
    assert jnp.allclose(rescale, rescale_ref, atol=1e-5, rtol=1e-5)
    assert jnp.allclose(soft, soft_ref, atol=1e-5, rtol=1e-5)


if __name__ == "__main__":
    # Deterministic "parameters" (the PyTorch module just stores 3 scalars).
    CTG, WATER, AIR = 1500.0, 0.0, -1000.0

    key = jax.random.PRNGKey(0)
    k0, k1 = jax.random.split(key)

    # Primary small test (matches the module: N=2, C=3, H=W=16).
    _check((2, 3, 16, 16), CTG, WATER, AIR, k0)
    # Secondary small test with a non-128-multiple spatial size (full-extent lane block).
    _check((2, 3, 24, 20), CTG, WATER, AIR, k1)

    print("KERNEL_OK")
</pallas_src>

<mosaic_0001>
module attributes {stable_mosaic.version = 11 : i64} {
  func.func @_percent_kernel(%arg0: i32, %arg1: i32, %arg2: memref<4xf32, #tpu.memory_space<smem>>, %arg3: memref<2x3x256xf32, #tpu.memory_space<vmem>>, %arg4: memref<2x1x256xf32, #tpu.memory_space<vmem>>, %arg5: memref<2x3x256xf32, #tpu.memory_space<vmem>>) attributes {dimension_semantics = [#tpu.dimension_semantics<parallel>, #tpu.dimension_semantics<parallel>], iteration_bounds = array<i64: 1, 1>, scalar_prefetch = 0 : i64, scratch_operands = 0 : i64, tpu.core_type = #tpu.core_type<tc>, window_params = [{transform_indices = @transform_0, window_bounds = array<i64: 4>}, {transform_indices = @transform_1, window_bounds = array<i64: 2, 3, 256>}, {transform_indices = @transform_2, window_bounds = array<i64: 2, 1, 256>}, {transform_indices = @transform_3, window_bounds = array<i64: 2, 3, 256>}]} {
    %c0 = arith.constant 0 : index
    %0 = memref.load %arg2[%c0] : memref<4xf32, #tpu.memory_space<smem>>
    %c1 = arith.constant 1 : index
    %1 = memref.load %arg2[%c1] : memref<4xf32, #tpu.memory_space<smem>>
    %c2 = arith.constant 2 : index
    %2 = memref.load %arg2[%c2] : memref<4xf32, #tpu.memory_space<smem>>
    %c3 = arith.constant 3 : index
    %3 = memref.load %arg2[%c3] : memref<4xf32, #tpu.memory_space<smem>>
    %c0_0 = arith.constant 0 : index
    %c0_1 = arith.constant 0 : index
    %c0_2 = arith.constant 0 : index
    %4 = vector.load %arg3[%c0_0, %c0_1, %c0_2] : memref<2x3x256xf32, #tpu.memory_space<vmem>>, vector<2x3x256xf32>
    %5 = vector.extract_strided_slice %4 {offsets = [0, 0, 0], sizes = [2, 1, 256], strides = [1, 1, 1]} : vector<2x3x256xf32> to vector<2x1x256xf32>
    %6 = vector.shape_cast %5 : vector<2x1x256xf32> to vector<2x256xf32>
    %7 = vector.extract_strided_slice %4 {offsets = [0, 1, 0], sizes = [2, 1, 256], strides = [1, 1, 1]} : vector<2x3x256xf32> to vector<2x1x256xf32>
    %8 = vector.shape_cast %7 : vector<2x1x256xf32> to vector<2x256xf32>
    %9 = vector.extract_strided_slice %4 {offsets = [0, 2, 0], sizes = [2, 1, 256], strides = [1, 1, 1]} : vector<2x3x256xf32> to vector<2x1x256xf32>
    %10 = vector.shape_cast %9 : vector<2x1x256xf32> to vector<2x256xf32>
    %11 = arith.maximumf %6, %8 : vector<2x256xf32>
    %12 = arith.maximumf %11, %10 : vector<2x256xf32>
    %13 = arith.subf %6, %12 : vector<2x256xf32>
    %14 = math.exp %13 : vector<2x256xf32>
    %15 = arith.subf %8, %12 : vector<2x256xf32>
    %16 = math.exp %15 : vector<2x256xf32>
    %17 = arith.subf %10, %12 : vector<2x256xf32>
    %18 = math.exp %17 : vector<2x256xf32>
    %19 = arith.addf %14, %16 : vector<2x256xf32>
    %20 = arith.addf %19, %18 : vector<2x256xf32>
    %cst = arith.constant 1.000000e+00 : f32
    %21 = vector.broadcast %cst : f32 to vector<2x256xf32>
    %22 = arith.divf %21, %20 : vector<2x256xf32>
    %23 = arith.mulf %14, %22 : vector<2x256xf32>
    %24 = arith.mulf %16, %22 : vector<2x256xf32>
    %25 = arith.mulf %18, %22 : vector<2x256xf32>
    %c0_3 = arith.constant 0 : index
    %c0_4 = arith.constant 0 : index
    %c0_5 = arith.constant 0 : index
    %26 = vector.load %arg5[%c0_3, %c0_4, %c0_5] : memref<2x3x256xf32, #tpu.memory_space<vmem>>, vector<2x1x256xf32>
    %27 = vector.shape_cast %26 : vector<2x1x256xf32> to vector<2x256xf32>
    %28 = vector.shape_cast %23 : vector<2x256xf32> to vector<2x1x256xf32>
    tpu.vector_store %arg5[%c0_3, %c0_4, %c0_5], %28 {strides = array<i32>} : memref<2x3x256xf32, #tpu.memory_space<vmem>>, vector<2x1x256xf32>,
    %c0_6 = arith.constant 0 : index
    %c1_7 = arith.constant 1 : index
    %c0_8 = arith.constant 0 : index
    %29 = vector.load %arg5[%c0_6, %c1_7, %c0_8] : memref<2x3x256xf32, #tpu.memory_space<vmem>>, vector<2x1x256xf32>
    %30 = vector.shape_cast %29 : vector<2x1x256xf32> to vector<2x256xf32>
    %31 = vector.shape_cast %24 : vector<2x256xf32> to vector<2x1x256xf32>
    tpu.vector_store %arg5[%c0_6, %c1_7, %c0_8], %31 {strides = array<i32>} : memref<2x3x256xf32, #tpu.memory_space<vmem>>, vector<2x1x256xf32>,
    %c0_9 = arith.constant 0 : index
    %c2_10 = arith.constant 2 : index
    %c0_11 = arith.constant 0 : index
    %32 = vector.load %arg5[%c0_9, %c2_10, %c0_11] : memref<2x3x256xf32, #tpu.memory_space<vmem>>, vector<2x1x256xf32>
    %33 = vector.shape_cast %32 : vector<2x1x256xf32> to vector<2x256xf32>
    %34 = vector.shape_cast %25 : vector<2x256xf32> to vector<2x1x256xf32>
    tpu.vector_store %arg5[%c0_9, %c2_10, %c0_11], %34 {strides = array<i32>} : memref<2x3x256xf32, #tpu.memory_space<vmem>>, vector<2x1x256xf32>,
    %35 = vector.broadcast %0 : f32 to vector<2x256xf32>
    %36 = arith.mulf %35, %23 : vector<2x256xf32>
    %37 = vector.broadcast %1 : f32 to vector<2x256xf32>
    %38 = arith.mulf %37, %24 : vector<2x256xf32>
    %39 = arith.addf %36, %38 : vector<2x256xf32>
    %40 = vector.broadcast %2 : f32 to vector<2x256xf32>
    %41 = arith.mulf %40, %25 : vector<2x256xf32>
    %42 = arith.addf %39, %41 : vector<2x256xf32>
    %43 = vector.broadcast %3 : f32 to vector<2x256xf32>
    %44 = arith.addf %42, %43 : vector<2x256xf32>
    %c0_12 = arith.constant 0 : index
    %c0_13 = arith.constant 0 : index
    %c0_14 = arith.constant 0 : index
    %45 = vector.load %arg4[%c0_12, %c0_13, %c0_14] : memref<2x1x256xf32, #tpu.memory_space<vmem>>, vector<2x1x256xf32>
    %46 = vector.shape_cast %45 : vector<2x1x256xf32> to vector<2x256xf32>
    %47 = vector.shape_cast %44 : vector<2x256xf32> to vector<2x1x256xf32>
    tpu.vector_store %arg4[%c0_12, %c0_13, %c0_14], %47 {strides = array<i32>} : memref<2x1x256xf32, #tpu.memory_space<vmem>>, vector<2x1x256xf32>,
    return
  }
  func.func @transform_0(%arg0: i32, %arg1: i32) -> i32 {
    %c0_i32 = arith.constant 0 : i32
    %c0_i32_0 = arith.constant 0 : i32
    return %c0_i32 : i32
  }
  func.func @transform_1(%arg0: i32, %arg1: i32) -> (i32, i32, i32) {
    %c0_i32 = arith.constant 0 : i32
    %c0_i32_0 = arith.constant 0 : i32
    return %arg0, %c0_i32, %arg1 : i32, i32, i32
  }
  func.func @transform_2(%arg0: i32, %arg1: i32) -> (i32, i32, i32) {
    %c0_i32 = arith.constant 0 : i32
    %c0_i32_0 = arith.constant 0 : i32
    return %arg0, %c0_i32, %arg1 : i32, i32, i32
  }
  func.func @transform_3(%arg0: i32, %arg1: i32) -> (i32, i32, i32) {
    %c0_i32 = arith.constant 0 : i32
    %c0_i32_0 = arith.constant 0 : i32
    return %arg0, %c0_i32, %arg1 : i32, i32, i32
  }
}

</mosaic_0001>

<bundles_post_ra>
// kernel: tpu_custom_call.1
= control target key start
LH: loop header
LB: loop body
LE: loop exit
PB: predicated region body
PF: predicated region fallthrough
CT: control target
= control target key end

     0   :  { %9 = vsyncpa [#allocation4], 0  ;;  %s430_s0 = inlined_call_operand.vmem [shape: f32[4], index: 0, kind: input, shape index: {}]   ;;  %s431_s1 = inlined_call_operand.vmem [shape: f32[2,3,256], index: 1, kind: input, shape index: {}]   ;;  %s432_s2 = inlined_call_operand.hbm [shape: f32[2,1,256], index: 2, kind: output, shape index: {0}]   ;;  %s433_s3 = inlined_call_operand.vmem [shape: f32[2,3,256], index: 3, kind: output, shape index: {1}]  }
   0x1   :  { %10 = vsyncpa [#allocation3], 0  ;;  %s16_s14 = sshll.u32 %s430_s0, 4  ;;  %s334_s15 = smov [#allocation2]   ;;  %s17_s14 = int_to_ptr.vmem [resolvable:$true] %s16_s14 }
   0x2   :  { %19 = dma.vmem_to_smem %s17_s14, 16, %s334_s15, [#allocation4]  }
   0x3   :  { %330 = dma.done.wait [#allocation4], 16  }
   0x4   :  { %331 = vsyncadd [#allocation4], 4294967280 }
   0x5   :  { %26 = sfence }
   0x6   :  { %v31_v0 = vld [vmem:[%s431_s1] sm:$0x77]  ;;  %v32_v1 = vld [vmem:[%s431_s1 + $0x8] sm:$0x77]  ;;  %s367_s0 = sld [smem:[#allocation2]]  ;;  %vm149_vm8 = vcmask 1040384  }
   0x7   :  { %v257_v2 = vrot.slane %v31_v0, 9  ;;  %v259_v3 = vrot.slane %v31_v0, 10  ;;  %v258_v4 = vrot.slane %v32_v1, 9  ;;  %v260_v5 = vrot.slane %v32_v1, 10  ;;  %s369_s1 = sld [smem:[#allocation2 + $0x1]]  ;;  %s335_s30 = smov [#allocation5]  }
   0x8   :  { %s371_s20 = sld [smem:[#allocation2 + $0x2]]  ;;  %s235_s4 = sshll.u32 %s335_s30, 4  ;;  %s236_s4 = int_to_ptr.vmem [resolvable:$true] %s235_s4 }
   0x9   :  { %v41_v6 = vmax.f32 %v31_v0, %v257_v2  ;;  %v42_v7 = vmax.f32 %v32_v1, %v258_v4  ;;  %s382_s21 = sld [smem:[#allocation2 + $0x3]]  ;;  %s237_s7 = sshll.u32 %s432_s2, 4  ;;  %s238_s7 = int_to_ptr.hbm [resolvable:$true] %s237_s7 }
   0xa   :  { %s336_s2 = smov 32   ;;  %s337_s10 = smov 2  }
   0xb   :  { %v49_v8 = vmax.f32 %v41_v6, %v259_v3  ;;  %v50_v9 = vmax.f32 %v42_v7, %v260_v5 }
   0xc   :  { %v189_v61 = vstv %s367_s0 }
   0xd   :  { %v51_v10 = vsub.f32 %v31_v0, %v49_v8  ;;  %v59_v11 = vrot.slane %v49_v8, 7  ;;  %v69_v12 = vrot.slane %v49_v8, 6  ;;  %v52_v13 = vsub.f32 %v32_v1, %v50_v9 }
   0xe   :  { %v60_v14 = vrot.slane %v50_v9, 7  ;;  %v70_v15 = vrot.slane %v50_v9, 6  ;;  %v192_v63 = vstv %s369_s1  ;;  %v205_v2 = vstv %s371_s20 }
   0xf   :  { %v53_v16 = vmul.f32 1.442695, %v51_v10  ;;  %v63_v17 = vsub.f32 %v31_v0, %v59_v11  ;;  %v73_v18 = vsub.f32 %v31_v0, %v69_v12  ;;  %v55_v19 = vmul.f32 1.442695, %v52_v13 }
  0x10   :  { %v64_v20 = vsub.f32 %v32_v1, %v60_v14  ;;  %v74_v21 = vsub.f32 %v32_v1, %v70_v15  ;;  %v154_v1 = vlaneseq }
  0x11   :  { %278 = vpow2.f32 %v53_v16  ;;  %v65_v22 = vmul.f32 1.442695, %v63_v17  ;;  %v75_v23 = vmul.f32 1.442695, %v73_v18 }
  0x12   :  { %280 = vpow2.f32 %v55_v19  ;;  %v67_v24 = vmul.f32 1.442695, %v64_v20  ;;  %v77_v25 = vmul.f32 1.442695, %v74_v21  ;;  %vm384_vm9 = vcmp.lt.s32.totalorder %v154_v1, 256 }
  0x13   :  { %282 = vpow2.f32 %v65_v22 }
  0x14   :  { %284 = vpow2.f32 %v75_v23 }
  0x15   :  { %286 = vpow2.f32 %v67_v24 }
  0x16   :  { %288 = vpow2.f32 %v77_v25 }
  0x17   :  { %v279_v26 = vpop.eup %278 }
  0x18   :  { %v281_v27 = vpop.eup %280 }
  0x19   :  { %v283_v28 = vpop.eup %282 }
  0x1a   :  { %v285_v29 = vpop.eup %284  ;;  %v261_v30 = vrot.slane %v283_v28, 9 }
  0x1b   :  { %v287_v31 = vpop.eup %286  ;;  %v263_v32 = vrot.slane %v285_v29, 10 }
  0x1c   :  { %v289_v33 = vpop.eup %288  ;;  %v87_v34 = vadd.f32 %v279_v26, %v261_v30  ;;  %v262_v35 = vrot.slane %v287_v31, 9 }
  0x1d   :  { %v264_v36 = vrot.slane %v289_v33, 10 }
  0x1e   :  { %v97_v37 = vadd.f32 %v263_v32, %v87_v34  ;;  %v88_v38 = vadd.f32 %v281_v27, %v262_v35 }
  0x20   :  { %290 = vrcp.f32 %v97_v37  ;;  %v98_v39 = vadd.f32 %v264_v36, %v88_v38  ;;  %v110_v42 = vand.u32 2147483648, %v97_v37  ;;  %vm104_vm0 = vweird.f32 %v97_v37 }
  0x21   :  { %v108_v45 = vand.u32 2147483647, %v97_v37 }
  0x22   :  { %292 = vrcp.f32 %v98_v39  ;;  %v111_v48 = vor.u32 1.1754944e-38, %v110_v42  ;;  %v125_v49 = vand.u32 2147483648, %v98_v39  ;;  %vm119_vm3 = vweird.f32 %v98_v39 }
  0x23   :  { %v123_v51 = vand.u32 2147483647, %v98_v39  ;;  %vm109_vm5 = vcmp.eq.f32.partialorder %v108_v45, 8.507059e+37 }
  0x24   :  { %v126_v56 = vor.u32 1.1754944e-38, %v125_v49 }
  0x25   :  { %vm124_vm7 = vcmp.eq.f32.partialorder %v123_v51, 8.507059e+37 }
  0x26   :  { %v291_v40 = vpop.eup %290 }
  0x27   :  { %v100_v41 = vmul.f32 %v291_v40, %v97_v37  ;;  %vm105_vm1 = vweird.f32 %v291_v40 }
  0x28   :  { %v293_v43 = vpop.eup %292  ;;  %vm106_vm2 = vmor %vm104_vm0, %vm105_vm1 }
  0x29   :  { %v101_v44 = vsub.f32 1.0, %v100_v41  ;;  %v115_v46 = vmul.f32 %v293_v43, %v98_v39  ;;  %vm120_vm4 = vweird.f32 %v293_v43 }
  0x2a   :  { %vm373_vm6 = vmor %vm119_vm3, %vm120_vm4 }
  0x2b   :  { %v102_v47 = vmul.f32 %v291_v40, %v101_v44  ;;  %v116_v50 = vsub.f32 1.0, %v115_v46 }
  0x2d   :  { %v103_v52 = vadd.f32 %v291_v40, %v102_v47  ;;  %v117_v53 = vmul.f32 %v293_v43, %v116_v50 }
  0x2f   :  { %v107_v54 = vsel %vm106_vm2, %v291_v40, %v103_v52  ;;  %v118_v58 = vadd.f32 %v293_v43, %v117_v53 }
  0x30   :  { %v112_v57 = vsel %vm109_vm5, %v111_v48, %v107_v54 }
  0x31   :  { %v129_v59 = vmul.f32 %v279_v26, %v112_v57  ;;  %v133_v60 = vrot.slane %v112_v57, 7  ;;  %v139_v62 = vrot.slane %v112_v57, 6  ;;  %v122_v0 = vsel %vm373_vm6, %v293_v43, %v118_v58 }
  0x32   :  { %v127_v4 = vsel %vm124_vm7, %v126_v56, %v122_v0 }
  0x33   :  { %v137_v3 = vmul.f32 %v283_v28, %v133_v60  ;;  %v143_v5 = vmul.f32 %v285_v29, %v139_v62  ;;  %v130_v6 = vmul.f32 %v281_v27, %v127_v4  ;;  %v134_v7 = vrot.slane %v127_v4, 7 }
  0x34   :  { %v140_v8 = vrot.slane %v127_v4, 6  ;;  %v147_v9 = vrot.slane %v129_v59, 3  ;;  %v190_v10 = vmul.f32 %v189_v61, %v129_v59  ;;  %v218_v27 = vstv %s382_s21 }
  0x35   :  { %163 = vst [vmem:[#allocation1] sm:$0xff] %v137_v3  ;;  %v193_v11 = vmul.f32 %v192_v63, %v137_v3  ;;  %v206_v12 = vmul.f32 %v205_v2, %v143_v5  ;;  %v138_v13 = vmul.f32 %v287_v31, %v134_v7  ;;  %v148_v19 = vrot.slane %v130_v6, 3 }
  0x36   :  { %v144_v15 = vmul.f32 %v289_v33, %v140_v8  ;;  %v150_v16 = vsel %vm149_vm8, %v129_v59, %v147_v9  ;;  %v191_v20 = vmul.f32 %v189_v61, %v130_v6 }
  0x37   :  { %v270_v17 = vrot.slane %v193_v11, 9  ;;  %v272_v18 = vrot.slane %v206_v12, 10  ;;  %158 = vst.msk [vmem:[%s433_s3] ss:$4 sm:$0x3] %vm384_vm9, %v150_v16  ;;  %v194_v21 = vmul.f32 %v192_v63, %v138_v13  ;;  %v151_v24 = vsel %vm149_vm8, %v130_v6, %v148_v19 }
  0x38   :  { %166 = vst [vmem:[#allocation1 + $0x20] sm:$0xff] %v138_v13  ;;  %v207_v22 = vmul.f32 %v205_v2, %v144_v15 }
  0x39   :  { %v203_v23 = vadd.f32 %v270_v17, %v190_v10  ;;  %v271_v25 = vrot.slane %v194_v21, 9  ;;  %265 = vst.msk [vmem:[%s433_s3 + $0x8] ss:$4 sm:$0x3] %vm384_vm9, %v151_v24 }
  0x3a   :  { %v273_v26 = vrot.slane %v207_v22, 10 }
  0x3b   :  { %v216_v28 = vadd.f32 %v272_v18, %v203_v23  ;;  %v204_v29 = vadd.f32 %v271_v25, %v191_v20 }
  0x3c   :  { %v165_v30 = vld [vmem:[#allocation1 + $0x1] ss:$4 sm:$0xff] }
  0x3d   :  { %266 = vst.msk [vmem:[%s433_s3 + $0x1] ss:$4 sm:$0x3] %vm384_vm9, %v165_v30  ;;  %v219_v31 = vadd.f32 %v218_v27, %v216_v28  ;;  %v217_v32 = vadd.f32 %v273_v26, %v204_v29 }
  0x3e   :  { %177 = vst [vmem:[#allocation1] sm:$0xff] %v143_v5 }
  0x3f   :  { %v168_v33 = vld [vmem:[#allocation1 + $0x21] ss:$4 sm:$0xff]  ;;  %v223_v34 = vrot.slane %v219_v31, 3  ;;  %v220_v35 = vadd.f32 %v218_v27, %v217_v32 }
  0x40   :  { %267 = vst.msk [vmem:[%s433_s3 + $0x9] ss:$4 sm:$0x3] %vm384_vm9, %v168_v33 }
  0x41   :  { %180 = vst [vmem:[#allocation1 + $0x20] sm:$0xff] %v144_v15  ;;  %v225_v36 = vsel %vm149_vm8, %v219_v31, %v223_v34  ;;  %v224_v37 = vrot.slane %v220_v35, 3 }
  0x42   :  { %229 = vst.msk [vmem:[#allocation5] sm:$0x3] %vm384_vm9, %v225_v36 }
  0x43   :  { %v226_v38 = vsel %vm149_vm8, %v220_v35, %v224_v37 }
  0x44   :  { %230 = vst.msk [vmem:[#allocation5 + $0x2] sm:$0x3] %vm384_vm9, %v226_v38 }
  0x45   :  { %v179_v39 = vld [vmem:[#allocation1 + $0x2] ss:$4 sm:$0xff]  ;;  %243 = dma.vmem_to_hbm [thread:$0]  %s236_s4, 64, %s238_s7, [#allocation3], %s336_s2, %s336_s2, %s337_s10  }
  0x46   :  { %268 = vst.msk [vmem:[%s433_s3 + $0x2] ss:$4 sm:$0x3] %vm384_vm9, %v179_v39 }
  0x48   :  { %v182_v40 = vld [vmem:[#allocation1 + $0x22] ss:$4 sm:$0xff] }
  0x49   :  { %269 = vst.msk [vmem:[%s433_s3 + $0xa] ss:$4 sm:$0x3] %vm384_vm9, %v182_v40 }
  0x4a   :  { %332 = dma.done.wait [#allocation3], 64  }
  0x4b   :  { %333 = vsyncadd [#allocation3], 4294967232 }
  0x4c   :  { %252 = vsyncpa [#allocation3], 1 }
  0x4d   :  { %253 = vsyncpa [#allocation4], 1 }

</bundles_post_ra>
